<compile_context>
chip_gen: v7x
topology: tpu7x:2x2x1
jax: 0.10.0
libtpu: 0.0.40
codegen_flags: <defaults>
</compile_context>

<pallas_src>
import functools
import math

import jax
import jax.numpy as jnp
from jax import lax
from jax.experimental import pallas as pl
from jax.experimental.pallas import tpu as pltpu


def _posemb_kernel(tok_ref, tbl_ref, pos_ref, out_ref, buf, sem, *,
                   scale, s_pad, tile_s, nsem, chunk):
    """One grid step = one (TS, E) tile of one batch row.

    tok_ref : SMEM (B * S_pad,) int32   -- scalar-prefetched flattened tokens
    tbl_ref : HBM  (V, E)               -- embedding table, raw ref (manual gather DMAs)
    pos_ref : VMEM (TS, E) float32      -- positional-embedding tile (resident across batch)
    out_ref : VMEM (TS, E) float32
    buf     : VMEM (TS, E) tbl.dtype    -- gathered embedding rows
    sem     : DMA semaphores, shape (nsem,)
    """
    st = pl.program_id(0)          # sequence-tile index (outer, parallel)
    b = pl.program_id(1)           # batch index (innermost -> pos tile reused)
    base = b * s_pad + st * tile_s
    vocab = tbl_ref.shape[0]
    n_tok = tok_ref.shape[0]

    def read_tok(idx):
        # Clamp the flat index (last tile of last batch may look past the end) and the
        # token id (matches XLA gather clip semantics; avoids OOB HBM DMA).
        tok = tok_ref[jnp.minimum(idx, n_tok - 1)]
        return jnp.minimum(jnp.maximum(tok, 0), vocab - 1)

    def start_row(r, tok):
        pltpu.make_async_copy(
            tbl_ref.at[pl.ds(tok, 1), :],
            buf.at[pl.ds(r, 1), :],
            sem.at[r & (nsem - 1)],
        ).start()

    def wait_row(r):
        # Wait descriptor only needs matching transfer size; src index is irrelevant.
        pltpu.make_async_copy(
            tbl_ref.at[pl.ds(0, 1), :],
            buf.at[pl.ds(r, 1), :],
            sem.at[r & (nsem - 1)],
        ).wait()

    # Prime the ring: keep up to `nsem` row gathers in flight.
    for r in range(nsem):
        start_row(r, read_tok(base + r))

    n_chunks = tile_s // chunk

    def chunk_body(c, carry):
        r0 = pl.multiple_of(c * chunk, chunk)
        for j in range(chunk):
            r = r0 + j
            nxt = r + nsem
            # Hoist the scalar token read ABOVE the wait: .wait() breaks SMEM sst->sld
            # forwarding, so do all scalar/address work first.
            tok_next = read_tok(base + nxt)
            wait_row(r)

            # Ring-slot aliasing: slot(r + nsem) == slot(r).  The start below must stay
            # strictly AFTER wait_row(r), otherwise the wait could be satisfied by the
            # wrong DMA.
            @pl.when(nxt < tile_s)
            def _():
                start_row(nxt, tok_next)

        # Stream the FMA + store for this sublane-aligned 8-row chunk so VPU work and
        # output stores overlap with the remaining in-flight gathers.
        rows = pl.ds(r0, chunk)
        out_ref[rows, :] = (buf[rows, :].astype(jnp.float32) * scale
                            + pos_ref[rows, :]).astype(out_ref.dtype)
        return carry

    lax.fori_loop(0, n_chunks, chunk_body, 0, unroll=min(4, n_chunks))
    # TODO(synk): nn.Dropout is identity in eval mode; training-mode dropout
    # (pltpu.prng_* masking) intentionally omitted.


def _choose_tile(S, E, *, itemsize=4, vmem_budget=24 * 1024 * 1024, ts_max=512):
    """Rows per tile: multiple of 8, sized so ~(buf + 2*pos + 2*out) fits the VMEM budget,
    preferring a tile that divides the (8-rounded) sequence length (no padding / no slice)."""
    bytes_per_row = max(1, E * itemsize)
    ts_fit = max(8, (vmem_budget // (5 * bytes_per_row)) // 8 * 8)
    ts_cap = int(min(ts_max, ts_fit))
    s8 = ((S + 7) // 8) * 8
    if s8 <= ts_cap:
        return s8
    for ts in range(ts_cap, 7, -8):
        if s8 % ts == 0:
            return ts
    return ts_cap


def positional_embedding_forward(tokens, emb_table, pos_embedding):
    """tokens: (B, S) int; emb_table: (V, E) f32/bf16; pos_embedding: (1, max_len, E) f32."""
    B, S = tokens.shape
    V, E = emb_table.shape
    max_len = pos_embedding.shape[1]
    if S > max_len:
        raise ValueError(f"sequence length {S} exceeds max_len {max_len}")

    scale = math.sqrt(E)

    TS = _choose_tile(S, E)
    S_pad = ((S + TS - 1) // TS) * TS
    NSEM = 32 if TS >= 32 else (16 if TS >= 16 else 8)   # DMA prefetch depth (power of 2 <= TS)
    CHUNK = 8                                            # sublane-aligned compute/store chunk

    tok = tokens.astype(jnp.int32)
    if S_pad != S:
        tok = jnp.pad(tok, ((0, 0), (0, S_pad - S)))     # tiny (int32 tokens only)
    tok_flat = tok.reshape(B * S_pad)

    pos = pos_embedding.astype(jnp.float32)
    if S_pad > max_len:                                  # rare fallback when TS doesn't divide S
        pos = jnp.pad(pos, ((0, 0), (0, S_pad - max_len), (0, 0)))

    kernel = functools.partial(_posemb_kernel, scale=scale, s_pad=S_pad,
                               tile_s=TS, nsem=NSEM, chunk=CHUNK)

    # buf + double-buffered pos + double-buffered out (+ headroom), capped for v7x.
    vmem_bytes = int(5 * TS * E * 4 * 1.25) + (2 << 20)
    vmem_limit = int(min(48 * 1024 * 1024, max(vmem_bytes, 4 * 1024 * 1024)))

    out = pl.pallas_call(
        kernel,
        out_shape=jax.ShapeDtypeStruct((B, S_pad, E), jnp.float32),
        grid_spec=pltpu.PrefetchScalarGridSpec(
            num_scalar_prefetch=1,                         # tokens -> SMEM
            grid=(S_pad // TS, B),                         # batch innermost -> pos tile reuse
            in_specs=[
                pl.BlockSpec(memory_space=pl.ANY),                          # table stays in HBM
                pl.BlockSpec((None, TS, E), lambda s, b, tok: (0, s, 0)),   # pos tile (depends on s only)
            ],
            out_specs=pl.BlockSpec((None, TS, E), lambda s, b, tok: (b, s, 0)),
            scratch_shapes=[
                pltpu.VMEM((TS, E), emb_table.dtype),      # gathered rows
                pltpu.SemaphoreType.DMA((NSEM,)),
            ],
        ),
        compiler_params=pltpu.CompilerParams(
            dimension_semantics=("parallel", "parallel"),
            vmem_limit_bytes=vmem_limit,
        ),
    )(tok_flat, emb_table, pos)

    if S_pad != S:
        out = out[:, :S, :]
    return out


def make_params(vocab_size, emb_size, max_len, key):
    """Deterministic parameter / buffer construction mirroring __init__."""
    emb_table = jax.random.normal(key, (vocab_size, emb_size), dtype=jnp.float32)

    rng = jnp.exp(-jnp.arange(0, emb_size, 2, dtype=jnp.float32)
                  * math.log(10000.0) / emb_size)                    # (ceil(E/2),)
    pos = jnp.arange(0, max_len, dtype=jnp.float32).reshape(max_len, 1)
    pe = jnp.zeros((max_len, emb_size), dtype=jnp.float32)
    pe = pe.at[:, 0::2].set(jnp.sin(pos * rng))
    pe = pe.at[:, 1::2].set(jnp.cos(pos * rng)[:, : emb_size // 2])  # safe for odd E too
    pos_embedding = pe[None, :, :]                                   # (1, max_len, E)
    return emb_table, pos_embedding


def reference_forward(tokens, emb_table, pos_embedding):
    E = emb_table.shape[1]
    token_emb = emb_table[tokens].astype(jnp.float32) * math.sqrt(E)  # (B, S, E)
    pos_emb = pos_embedding[:, :tokens.shape[1]]                      # (1, S, E)
    return token_emb + pos_emb                                        # dropout = identity (eval)


if __name__ == "__main__":
    vocab_size, emb_size, max_len = 64, 32, 16
    B, S = 2, 8

    key = jax.random.PRNGKey(0)
    k_emb, k_tok = jax.random.split(key)
    emb_table, pos_embedding = make_params(vocab_size, emb_size, max_len, k_emb)
    tokens = jax.random.randint(k_tok, (B, S), 0, vocab_size, dtype=jnp.int32)

    out = positional_embedding_forward(tokens, emb_table, pos_embedding)
    out = jax.block_until_ready(out)

    ref = reference_forward(tokens, emb_table, pos_embedding)
    assert out.shape == (B, S, emb_size)
    assert jnp.allclose(out, ref, atol=1e-5, rtol=1e-5), "mismatch vs reference"
    print("KERNEL_OK")
</pallas_src>

<mosaic_0001>
module attributes {stable_mosaic.version = 11 : i64} {
  func.func @_posemb_kernel(%arg0: i32, %arg1: i32, %arg2: memref<16xi32, #tpu.memory_space<smem>>, %arg3: memref<64x32xf32, #tpu.memory_space<any>>, %arg4: memref<1x8x32xf32, #tpu.memory_space<vmem>>, %arg5: memref<1x8x32xf32, #tpu.memory_space<vmem>>, %arg6: memref<8x32xf32, #tpu.memory_space<vmem>>, %arg7: memref<8x!tpu.dma_semaphore, #tpu.memory_space<semaphore_mem>>) attributes {dimension_semantics = [#tpu.dimension_semantics<parallel>, #tpu.dimension_semantics<parallel>], iteration_bounds = array<i64: 1, 2>, scalar_prefetch = 1 : i64, scratch_operands = 2 : i64, tpu.core_type = #tpu.core_type<tc>, window_params = [{}, {transform_indices = @transform_1, window_bounds = array<i64: 1, 8, 32>}, {transform_indices = @transform_2, window_bounds = array<i64: 1, 8, 32>}]} {
    %c8_i32 = arith.constant 8 : i32
    %0 = arith.muli %arg1, %c8_i32 : i32
    %c8_i32_0 = arith.constant 8 : i32
    %1 = arith.muli %arg0, %c8_i32_0 : i32
    %2 = arith.addi %0, %1 : i32
    %c0_i32 = arith.constant 0 : i32
    %3 = arith.addi %2, %c0_i32 : i32
    %c15_i32 = arith.constant 15 : i32
    %4 = arith.minsi %3, %c15_i32 : i32
    %5 = arith.index_cast %4 : i32 to index
    %6 = memref.load %arg2[%5] : memref<16xi32, #tpu.memory_space<smem>>
    %c0_i32_1 = arith.constant 0 : i32
    %7 = arith.maxsi %6, %c0_i32_1 : i32
    %c63_i32 = arith.constant 63 : i32
    %8 = arith.minsi %7, %c63_i32 : i32
    %c0_i32_2 = arith.constant 0 : i32
    %c0_i32_3 = arith.constant 0 : i32
    %9 = tpu.memref_slice %arg3[%8, %c0_i32_3] : memref<64x32xf32, #tpu.memory_space<any>> -> memref<1x32xf32, #tpu.memory_space<any>>
    %c0_i32_4 = arith.constant 0 : i32
    %c0_i32_5 = arith.constant 0 : i32
    %10 = tpu.memref_slice %arg6[%c0_i32_4, %c0_i32_5] : memref<8x32xf32, #tpu.memory_space<vmem>> -> memref<1x32xf32, #tpu.memory_space<vmem>>
    %11 = tpu.memref_slice %arg7[%c0_i32_2] : memref<8x!tpu.dma_semaphore, #tpu.memory_space<semaphore_mem>> -> memref<1x!tpu.dma_semaphore, #tpu.memory_space<semaphore_mem>>
    %12 = tpu.memref_squeeze %11 : memref<1x!tpu.dma_semaphore, #tpu.memory_space<semaphore_mem>> -> memref<!tpu.dma_semaphore, #tpu.memory_space<semaphore_mem>>
    tpu.enqueue_dma source(%9 : memref<1x32xf32, #tpu.memory_space<any>>) target(%10 : memref<1x32xf32, #tpu.memory_space<vmem>>) target_semaphore(%12 : memref<!tpu.dma_semaphore, #tpu.memory_space<semaphore_mem>>)
    %c1_i32 = arith.constant 1 : i32
    %13 = arith.addi %2, %c1_i32 : i32
    %c15_i32_6 = arith.constant 15 : i32
    %14 = arith.minsi %13, %c15_i32_6 : i32
    %15 = arith.index_cast %14 : i32 to index
    %16 = memref.load %arg2[%15] : memref<16xi32, #tpu.memory_space<smem>>
    %c0_i32_7 = arith.constant 0 : i32
    %17 = arith.maxsi %16, %c0_i32_7 : i32
    %c63_i32_8 = arith.constant 63 : i32
    %18 = arith.minsi %17, %c63_i32_8 : i32
    %c1_i32_9 = arith.constant 1 : i32
    %c0_i32_10 = arith.constant 0 : i32
    %19 = tpu.memref_slice %arg3[%18, %c0_i32_10] : memref<64x32xf32, #tpu.memory_space<any>> -> memref<1x32xf32, #tpu.memory_space<any>>
    %c1_i32_11 = arith.constant 1 : i32
    %c0_i32_12 = arith.constant 0 : i32
    %20 = tpu.memref_slice %arg6[%c1_i32_11, %c0_i32_12] : memref<8x32xf32, #tpu.memory_space<vmem>> -> memref<1x32xf32, #tpu.memory_space<vmem>>
    %21 = tpu.memref_slice %arg7[%c1_i32_9] : memref<8x!tpu.dma_semaphore, #tpu.memory_space<semaphore_mem>> -> memref<1x!tpu.dma_semaphore, #tpu.memory_space<semaphore_mem>>
    %22 = tpu.memref_squeeze %21 : memref<1x!tpu.dma_semaphore, #tpu.memory_space<semaphore_mem>> -> memref<!tpu.dma_semaphore, #tpu.memory_space<semaphore_mem>>
    tpu.enqueue_dma source(%19 : memref<1x32xf32, #tpu.memory_space<any>>) target(%20 : memref<1x32xf32, #tpu.memory_space<vmem>>) target_semaphore(%22 : memref<!tpu.dma_semaphore, #tpu.memory_space<semaphore_mem>>)
    %c2_i32 = arith.constant 2 : i32
    %23 = arith.addi %2, %c2_i32 : i32
    %c15_i32_13 = arith.constant 15 : i32
    %24 = arith.minsi %23, %c15_i32_13 : i32
    %25 = arith.index_cast %24 : i32 to index
    %26 = memref.load %arg2[%25] : memref<16xi32, #tpu.memory_space<smem>>
    %c0_i32_14 = arith.constant 0 : i32
    %27 = arith.maxsi %26, %c0_i32_14 : i32
    %c63_i32_15 = arith.constant 63 : i32
    %28 = arith.minsi %27, %c63_i32_15 : i32
    %c2_i32_16 = arith.constant 2 : i32
    %c0_i32_17 = arith.constant 0 : i32
    %29 = tpu.memref_slice %arg3[%28, %c0_i32_17] : memref<64x32xf32, #tpu.memory_space<any>> -> memref<1x32xf32, #tpu.memory_space<any>>
    %c2_i32_18 = arith.constant 2 : i32
    %c0_i32_19 = arith.constant 0 : i32
    %30 = tpu.memref_slice %arg6[%c2_i32_18, %c0_i32_19] : memref<8x32xf32, #tpu.memory_space<vmem>> -> memref<1x32xf32, #tpu.memory_space<vmem>>
    %31 = tpu.memref_slice %arg7[%c2_i32_16] : memref<8x!tpu.dma_semaphore, #tpu.memory_space<semaphore_mem>> -> memref<1x!tpu.dma_semaphore, #tpu.memory_space<semaphore_mem>>
    %32 = tpu.memref_squeeze %31 : memref<1x!tpu.dma_semaphore, #tpu.memory_space<semaphore_mem>> -> memref<!tpu.dma_semaphore, #tpu.memory_space<semaphore_mem>>
    tpu.enqueue_dma source(%29 : memref<1x32xf32, #tpu.memory_space<any>>) target(%30 : memref<1x32xf32, #tpu.memory_space<vmem>>) target_semaphore(%32 : memref<!tpu.dma_semaphore, #tpu.memory_space<semaphore_mem>>)
    %c3_i32 = arith.constant 3 : i32
    %33 = arith.addi %2, %c3_i32 : i32
    %c15_i32_20 = arith.constant 15 : i32
    %34 = arith.minsi %33, %c15_i32_20 : i32
    %35 = arith.index_cast %34 : i32 to index
    %36 = memref.load %arg2[%35] : memref<16xi32, #tpu.memory_space<smem>>
    %c0_i32_21 = arith.constant 0 : i32
    %37 = arith.maxsi %36, %c0_i32_21 : i32
    %c63_i32_22 = arith.constant 63 : i32
    %38 = arith.minsi %37, %c63_i32_22 : i32
    %c3_i32_23 = arith.constant 3 : i32
    %c0_i32_24 = arith.constant 0 : i32
    %39 = tpu.memref_slice %arg3[%38, %c0_i32_24] : memref<64x32xf32, #tpu.memory_space<any>> -> memref<1x32xf32, #tpu.memory_space<any>>
    %c3_i32_25 = arith.constant 3 : i32
    %c0_i32_26 = arith.constant 0 : i32
    %40 = tpu.memref_slice %arg6[%c3_i32_25, %c0_i32_26] : memref<8x32xf32, #tpu.memory_space<vmem>> -> memref<1x32xf32, #tpu.memory_space<vmem>>
    %41 = tpu.memref_slice %arg7[%c3_i32_23] : memref<8x!tpu.dma_semaphore, #tpu.memory_space<semaphore_mem>> -> memref<1x!tpu.dma_semaphore, #tpu.memory_space<semaphore_mem>>
    %42 = tpu.memref_squeeze %41 : memref<1x!tpu.dma_semaphore, #tpu.memory_space<semaphore_mem>> -> memref<!tpu.dma_semaphore, #tpu.memory_space<semaphore_mem>>
    tpu.enqueue_dma source(%39 : memref<1x32xf32, #tpu.memory_space<any>>) target(%40 : memref<1x32xf32, #tpu.memory_space<vmem>>) target_semaphore(%42 : memref<!tpu.dma_semaphore, #tpu.memory_space<semaphore_mem>>)
    %c4_i32 = arith.constant 4 : i32
    %43 = arith.addi %2, %c4_i32 : i32
    %c15_i32_27 = arith.constant 15 : i32
    %44 = arith.minsi %43, %c15_i32_27 : i32
    %45 = arith.index_cast %44 : i32 to index
    %46 = memref.load %arg2[%45] : memref<16xi32, #tpu.memory_space<smem>>
    %c0_i32_28 = arith.constant 0 : i32
    %47 = arith.maxsi %46, %c0_i32_28 : i32
    %c63_i32_29 = arith.constant 63 : i32
    %48 = arith.minsi %47, %c63_i32_29 : i32
    %c4_i32_30 = arith.constant 4 : i32
    %c0_i32_31 = arith.constant 0 : i32
    %49 = tpu.memref_slice %arg3[%48, %c0_i32_31] : memref<64x32xf32, #tpu.memory_space<any>> -> memref<1x32xf32, #tpu.memory_space<any>>
    %c4_i32_32 = arith.constant 4 : i32
    %c0_i32_33 = arith.constant 0 : i32
    %50 = tpu.memref_slice %arg6[%c4_i32_32, %c0_i32_33] : memref<8x32xf32, #tpu.memory_space<vmem>> -> memref<1x32xf32, #tpu.memory_space<vmem>>
    %51 = tpu.memref_slice %arg7[%c4_i32_30] : memref<8x!tpu.dma_semaphore, #tpu.memory_space<semaphore_mem>> -> memref<1x!tpu.dma_semaphore, #tpu.memory_space<semaphore_mem>>
    %52 = tpu.memref_squeeze %51 : memref<1x!tpu.dma_semaphore, #tpu.memory_space<semaphore_mem>> -> memref<!tpu.dma_semaphore, #tpu.memory_space<semaphore_mem>>
    tpu.enqueue_dma source(%49 : memref<1x32xf32, #tpu.memory_space<any>>) target(%50 : memref<1x32xf32, #tpu.memory_space<vmem>>) target_semaphore(%52 : memref<!tpu.dma_semaphore, #tpu.memory_space<semaphore_mem>>)
    %c5_i32 = arith.constant 5 : i32
    %53 = arith.addi %2, %c5_i32 : i32
    %c15_i32_34 = arith.constant 15 : i32
    %54 = arith.minsi %53, %c15_i32_34 : i32
    %55 = arith.index_cast %54 : i32 to index
    %56 = memref.load %arg2[%55] : memref<16xi32, #tpu.memory_space<smem>>
    %c0_i32_35 = arith.constant 0 : i32
    %57 = arith.maxsi %56, %c0_i32_35 : i32
    %c63_i32_36 = arith.constant 63 : i32
    %58 = arith.minsi %57, %c63_i32_36 : i32
    %c5_i32_37 = arith.constant 5 : i32
    %c0_i32_38 = arith.constant 0 : i32
    %59 = tpu.memref_slice %arg3[%58, %c0_i32_38] : memref<64x32xf32, #tpu.memory_space<any>> -> memref<1x32xf32, #tpu.memory_space<any>>
    %c5_i32_39 = arith.constant 5 : i32
    %c0_i32_40 = arith.constant 0 : i32
    %60 = tpu.memref_slice %arg6[%c5_i32_39, %c0_i32_40] : memref<8x32xf32, #tpu.memory_space<vmem>> -> memref<1x32xf32, #tpu.memory_space<vmem>>
    %61 = tpu.memref_slice %arg7[%c5_i32_37] : memref<8x!tpu.dma_semaphore, #tpu.memory_space<semaphore_mem>> -> memref<1x!tpu.dma_semaphore, #tpu.memory_space<semaphore_mem>>
    %62 = tpu.memref_squeeze %61 : memref<1x!tpu.dma_semaphore, #tpu.memory_space<semaphore_mem>> -> memref<!tpu.dma_semaphore, #tpu.memory_space<semaphore_mem>>
    tpu.enqueue_dma source(%59 : memref<1x32xf32, #tpu.memory_space<any>>) target(%60 : memref<1x32xf32, #tpu.memory_space<vmem>>) target_semaphore(%62 : memref<!tpu.dma_semaphore, #tpu.memory_space<semaphore_mem>>)
    %c6_i32 = arith.constant 6 : i32
    %63 = arith.addi %2, %c6_i32 : i32
    %c15_i32_41 = arith.constant 15 : i32
    %64 = arith.minsi %63, %c15_i32_41 : i32
    %65 = arith.index_cast %64 : i32 to index
    %66 = memref.load %arg2[%65] : memref<16xi32, #tpu.memory_space<smem>>
    %c0_i32_42 = arith.constant 0 : i32
    %67 = arith.maxsi %66, %c0_i32_42 : i32
    %c63_i32_43 = arith.constant 63 : i32
    %68 = arith.minsi %67, %c63_i32_43 : i32
    %c6_i32_44 = arith.constant 6 : i32
    %c0_i32_45 = arith.constant 0 : i32
    %69 = tpu.memref_slice %arg3[%68, %c0_i32_45] : memref<64x32xf32, #tpu.memory_space<any>> -> memref<1x32xf32, #tpu.memory_space<any>>
    %c6_i32_46 = arith.constant 6 : i32
    %c0_i32_47 = arith.constant 0 : i32
    %70 = tpu.memref_slice %arg6[%c6_i32_46, %c0_i32_47] : memref<8x32xf32, #tpu.memory_space<vmem>> -> memref<1x32xf32, #tpu.memory_space<vmem>>
    %71 = tpu.memref_slice %arg7[%c6_i32_44] : memref<8x!tpu.dma_semaphore, #tpu.memory_space<semaphore_mem>> -> memref<1x!tpu.dma_semaphore, #tpu.memory_space<semaphore_mem>>
    %72 = tpu.memref_squeeze %71 : memref<1x!tpu.dma_semaphore, #tpu.memory_space<semaphore_mem>> -> memref<!tpu.dma_semaphore, #tpu.memory_space<semaphore_mem>>
    tpu.enqueue_dma source(%69 : memref<1x32xf32, #tpu.memory_space<any>>) target(%70 : memref<1x32xf32, #tpu.memory_space<vmem>>) target_semaphore(%72 : memref<!tpu.dma_semaphore, #tpu.memory_space<semaphore_mem>>)
    %c7_i32 = arith.constant 7 : i32
    %73 = arith.addi %2, %c7_i32 : i32
    %c15_i32_48 = arith.constant 15 : i32
    %74 = arith.minsi %73, %c15_i32_48 : i32
    %75 = arith.index_cast %74 : i32 to index
    %76 = memref.load %arg2[%75] : memref<16xi32, #tpu.memory_space<smem>>
    %c0_i32_49 = arith.constant 0 : i32
    %77 = arith.maxsi %76, %c0_i32_49 : i32
    %c63_i32_50 = arith.constant 63 : i32
    %78 = arith.minsi %77, %c63_i32_50 : i32
    %c7_i32_51 = arith.constant 7 : i32
    %c0_i32_52 = arith.constant 0 : i32
    %79 = tpu.memref_slice %arg3[%78, %c0_i32_52] : memref<64x32xf32, #tpu.memory_space<any>> -> memref<1x32xf32, #tpu.memory_space<any>>
    %c7_i32_53 = arith.constant 7 : i32
    %c0_i32_54 = arith.constant 0 : i32
    %80 = tpu.memref_slice %arg6[%c7_i32_53, %c0_i32_54] : memref<8x32xf32, #tpu.memory_space<vmem>> -> memref<1x32xf32, #tpu.memory_space<vmem>>
    %81 = tpu.memref_slice %arg7[%c7_i32_51] : memref<8x!tpu.dma_semaphore, #tpu.memory_space<semaphore_mem>> -> memref<1x!tpu.dma_semaphore, #tpu.memory_space<semaphore_mem>>
    %82 = tpu.memref_squeeze %81 : memref<1x!tpu.dma_semaphore, #tpu.memory_space<semaphore_mem>> -> memref<!tpu.dma_semaphore, #tpu.memory_space<semaphore_mem>>
    tpu.enqueue_dma source(%79 : memref<1x32xf32, #tpu.memory_space<any>>) target(%80 : memref<1x32xf32, #tpu.memory_space<vmem>>) target_semaphore(%82 : memref<!tpu.dma_semaphore, #tpu.memory_space<semaphore_mem>>)
    %c0_i32_55 = arith.constant 0 : i32
    %c8_i32_56 = arith.constant 8 : i32
    %83 = arith.muli %c0_i32_55, %c8_i32_56 : i32
    %84 = tpu.assume_multiple %83, 8 : i32
    %c0_i32_57 = arith.constant 0 : i32
    %85 = arith.addi %84, %c0_i32_57 : i32
    %c8_i32_58 = arith.constant 8 : i32
    %86 = arith.addi %85, %c8_i32_58 : i32
    %87 = arith.addi %2, %86 : i32
    %c15_i32_59 = arith.constant 15 : i32
    %88 = arith.minsi %87, %c15_i32_59 : i32
    %89 = arith.index_cast %88 : i32 to index
    %90 = memref.load %arg2[%89] : memref<16xi32, #tpu.memory_space<smem>>
    %c0_i32_60 = arith.constant 0 : i32
    %91 = arith.maxsi %90, %c0_i32_60 : i32
    %c63_i32_61 = arith.constant 63 : i32
    %92 = arith.minsi %91, %c63_i32_61 : i32
    %c7_i32_62 = arith.constant 7 : i32
    %93 = arith.andi %85, %c7_i32_62 : i32
    %c0_i32_63 = arith.constant 0 : i32
    %c0_i32_64 = arith.constant 0 : i32
    %94 = tpu.memref_slice %arg3[%c0_i32_63, %c0_i32_64] : memref<64x32xf32, #tpu.memory_space<any>> -> memref<1x32xf32, #tpu.memory_space<any>>
    %c0_i32_65 = arith.constant 0 : i32
    %95 = tpu.memref_slice %arg6[%85, %c0_i32_65] : memref<8x32xf32, #tpu.memory_space<vmem>> -> memref<1x32xf32, #tpu.memory_space<vmem>>
    %96 = tpu.memref_slice %arg7[%93] : memref<8x!tpu.dma_semaphore, #tpu.memory_space<semaphore_mem>> -> memref<1x!tpu.dma_semaphore, #tpu.memory_space<semaphore_mem>>
    %97 = tpu.memref_squeeze %96 : memref<1x!tpu.dma_semaphore, #tpu.memory_space<semaphore_mem>> -> memref<!tpu.dma_semaphore, #tpu.memory_space<semaphore_mem>>
    tpu.wait_dma2 semaphore(%97 : memref<!tpu.dma_semaphore, #tpu.memory_space<semaphore_mem>>) src(%94 : memref<1x32xf32, #tpu.memory_space<any>>) dst(%95 : memref<1x32xf32, #tpu.memory_space<vmem>>)
    %c8_i32_66 = arith.constant 8 : i32
    %98 = arith.cmpi slt, %86, %c8_i32_66 : i32
    %99 = arith.extui %98 : i1 to i32
    %c0_i32_67 = arith.constant 0 : i32
    %100 = arith.cmpi ne, %99, %c0_i32_67 : i32
    scf.if %100 {
      %c7_i32_150 = arith.constant 7 : i32
      %225 = arith.andi %86, %c7_i32_150 : i32
      %c0_i32_151 = arith.constant 0 : i32
      %226 = tpu.memref_slice %arg3[%92, %c0_i32_151] : memref<64x32xf32, #tpu.memory_space<any>> -> memref<1x32xf32, #tpu.memory_space<any>>
      %c0_i32_152 = arith.constant 0 : i32
      %227 = tpu.memref_slice %arg6[%86, %c0_i32_152] : memref<8x32xf32, #tpu.memory_space<vmem>> -> memref<1x32xf32, #tpu.memory_space<vmem>>
      %228 = tpu.memref_slice %arg7[%225] : memref<8x!tpu.dma_semaphore, #tpu.memory_space<semaphore_mem>> -> memref<1x!tpu.dma_semaphore, #tpu.memory_space<semaphore_mem>>
      %229 = tpu.memref_squeeze %228 : memref<1x!tpu.dma_semaphore, #tpu.memory_space<semaphore_mem>> -> memref<!tpu.dma_semaphore, #tpu.memory_space<semaphore_mem>>
      tpu.enqueue_dma source(%226 : memref<1x32xf32, #tpu.memory_space<any>>) target(%227 : memref<1x32xf32, #tpu.memory_space<vmem>>) target_semaphore(%229 : memref<!tpu.dma_semaphore, #tpu.memory_space<semaphore_mem>>)
    } else {
    }
    %c1_i32_68 = arith.constant 1 : i32
    %101 = arith.addi %84, %c1_i32_68 : i32
    %c8_i32_69 = arith.constant 8 : i32
    %102 = arith.addi %101, %c8_i32_69 : i32
    %103 = arith.addi %2, %102 : i32
    %c15_i32_70 = arith.constant 15 : i32
    %104 = arith.minsi %103, %c15_i32_70 : i32
    %105 = arith.index_cast %104 : i32 to index
    %106 = memref.load %arg2[%105] : memref<16xi32, #tpu.memory_space<smem>>
    %c0_i32_71 = arith.constant 0 : i32
    %107 = arith.maxsi %106, %c0_i32_71 : i32
    %c63_i32_72 = arith.constant 63 : i32
    %108 = arith.minsi %107, %c63_i32_72 : i32
    %c7_i32_73 = arith.constant 7 : i32
    %109 = arith.andi %101, %c7_i32_73 : i32
    %c0_i32_74 = arith.constant 0 : i32
    %c0_i32_75 = arith.constant 0 : i32
    %110 = tpu.memref_slice %arg3[%c0_i32_74, %c0_i32_75] : memref<64x32xf32, #tpu.memory_space<any>> -> memref<1x32xf32, #tpu.memory_space<any>>
    %c0_i32_76 = arith.constant 0 : i32
    %111 = tpu.memref_slice %arg6[%101, %c0_i32_76] : memref<8x32xf32, #tpu.memory_space<vmem>> -> memref<1x32xf32, #tpu.memory_space<vmem>>
    %112 = tpu.memref_slice %arg7[%109] : memref<8x!tpu.dma_semaphore, #tpu.memory_space<semaphore_mem>> -> memref<1x!tpu.dma_semaphore, #tpu.memory_space<semaphore_mem>>
    %113 = tpu.memref_squeeze %112 : memref<1x!tpu.dma_semaphore, #tpu.memory_space<semaphore_mem>> -> memref<!tpu.dma_semaphore, #tpu.memory_space<semaphore_mem>>
    tpu.wait_dma2 semaphore(%113 : memref<!tpu.dma_semaphore, #tpu.memory_space<semaphore_mem>>) src(%110 : memref<1x32xf32, #tpu.memory_space<any>>) dst(%111 : memref<1x32xf32, #tpu.memory_space<vmem>>)
    %c8_i32_77 = arith.constant 8 : i32
    %114 = arith.cmpi slt, %102, %c8_i32_77 : i32
    %115 = arith.extui %114 : i1 to i32
    %c0_i32_78 = arith.constant 0 : i32
    %116 = arith.cmpi ne, %115, %c0_i32_78 : i32
    scf.if %116 {
      %c7_i32_150 = arith.constant 7 : i32
      %225 = arith.andi %102, %c7_i32_150 : i32
      %c0_i32_151 = arith.constant 0 : i32
      %226 = tpu.memref_slice %arg3[%108, %c0_i32_151] : memref<64x32xf32, #tpu.memory_space<any>> -> memref<1x32xf32, #tpu.memory_space<any>>
      %c0_i32_152 = arith.constant 0 : i32
      %227 = tpu.memref_slice %arg6[%102, %c0_i32_152] : memref<8x32xf32, #tpu.memory_space<vmem>> -> memref<1x32xf32, #tpu.memory_space<vmem>>
      %228 = tpu.memref_slice %arg7[%225] : memref<8x!tpu.dma_semaphore, #tpu.memory_space<semaphore_mem>> -> memref<1x!tpu.dma_semaphore, #tpu.memory_space<semaphore_mem>>
      %229 = tpu.memref_squeeze %228 : memref<1x!tpu.dma_semaphore, #tpu.memory_space<semaphore_mem>> -> memref<!tpu.dma_semaphore, #tpu.memory_space<semaphore_mem>>
      tpu.enqueue_dma source(%226 : memref<1x32xf32, #tpu.memory_space<any>>) target(%227 : memref<1x32xf32, #tpu.memory_space<vmem>>) target_semaphore(%229 : memref<!tpu.dma_semaphore, #tpu.memory_space<semaphore_mem>>)
    } else {
    }
    %c2_i32_79 = arith.constant 2 : i32
    %117 = arith.addi %84, %c2_i32_79 : i32
    %c8_i32_80 = arith.constant 8 : i32
    %118 = arith.addi %117, %c8_i32_80 : i32
    %119 = arith.addi %2, %118 : i32
    %c15_i32_81 = arith.constant 15 : i32
    %120 = arith.minsi %119, %c15_i32_81 : i32
    %121 = arith.index_cast %120 : i32 to index
    %122 = memref.load %arg2[%121] : memref<16xi32, #tpu.memory_space<smem>>
    %c0_i32_82 = arith.constant 0 : i32
    %123 = arith.maxsi %122, %c0_i32_82 : i32
    %c63_i32_83 = arith.constant 63 : i32
    %124 = arith.minsi %123, %c63_i32_83 : i32
    %c7_i32_84 = arith.constant 7 : i32
    %125 = arith.andi %117, %c7_i32_84 : i32
    %c0_i32_85 = arith.constant 0 : i32
    %c0_i32_86 = arith.constant 0 : i32
    %126 = tpu.memref_slice %arg3[%c0_i32_85, %c0_i32_86] : memref<64x32xf32, #tpu.memory_space<any>> -> memref<1x32xf32, #tpu.memory_space<any>>
    %c0_i32_87 = arith.constant 0 : i32
    %127 = tpu.memref_slice %arg6[%117, %c0_i32_87] : memref<8x32xf32, #tpu.memory_space<vmem>> -> memref<1x32xf32, #tpu.memory_space<vmem>>
    %128 = tpu.memref_slice %arg7[%125] : memref<8x!tpu.dma_semaphore, #tpu.memory_space<semaphore_mem>> -> memref<1x!tpu.dma_semaphore, #tpu.memory_space<semaphore_mem>>
    %129 = tpu.memref_squeeze %128 : memref<1x!tpu.dma_semaphore, #tpu.memory_space<semaphore_mem>> -> memref<!tpu.dma_semaphore, #tpu.memory_space<semaphore_mem>>
    tpu.wait_dma2 semaphore(%129 : memref<!tpu.dma_semaphore, #tpu.memory_space<semaphore_mem>>) src(%126 : memref<1x32xf32, #tpu.memory_space<any>>) dst(%127 : memref<1x32xf32, #tpu.memory_space<vmem>>)
    %c8_i32_88 = arith.constant 8 : i32
    %130 = arith.cmpi slt, %118, %c8_i32_88 : i32
    %131 = arith.extui %130 : i1 to i32
    %c0_i32_89 = arith.constant 0 : i32
    %132 = arith.cmpi ne, %131, %c0_i32_89 : i32
    scf.if %132 {
      %c7_i32_150 = arith.constant 7 : i32
      %225 = arith.andi %118, %c7_i32_150 : i32
      %c0_i32_151 = arith.constant 0 : i32
      %226 = tpu.memref_slice %arg3[%124, %c0_i32_151] : memref<64x32xf32, #tpu.memory_space<any>> -> memref<1x32xf32, #tpu.memory_space<any>>
      %c0_i32_152 = arith.constant 0 : i32
      %227 = tpu.memref_slice %arg6[%118, %c0_i32_152] : memref<8x32xf32, #tpu.memory_space<vmem>> -> memref<1x32xf32, #tpu.memory_space<vmem>>
      %228 = tpu.memref_slice %arg7[%225] : memref<8x!tpu.dma_semaphore, #tpu.memory_space<semaphore_mem>> -> memref<1x!tpu.dma_semaphore, #tpu.memory_space<semaphore_mem>>
      %229 = tpu.memref_squeeze %228 : memref<1x!tpu.dma_semaphore, #tpu.memory_space<semaphore_mem>> -> memref<!tpu.dma_semaphore, #tpu.memory_space<semaphore_mem>>
      tpu.enqueue_dma source(%226 : memref<1x32xf32, #tpu.memory_space<any>>) target(%227 : memref<1x32xf32, #tpu.memory_space<vmem>>) target_semaphore(%229 : memref<!tpu.dma_semaphore, #tpu.memory_space<semaphore_mem>>)
    } else {
    }
    %c3_i32_90 = arith.constant 3 : i32
    %133 = arith.addi %84, %c3_i32_90 : i32
    %c8_i32_91 = arith.constant 8 : i32
    %134 = arith.addi %133, %c8_i32_91 : i32
    %135 = arith.addi %2, %134 : i32
    %c15_i32_92 = arith.constant 15 : i32
    %136 = arith.minsi %135, %c15_i32_92 : i32
    %137 = arith.index_cast %136 : i32 to index
    %138 = memref.load %arg2[%137] : memref<16xi32, #tpu.memory_space<smem>>
    %c0_i32_93 = arith.constant 0 : i32
    %139 = arith.maxsi %138, %c0_i32_93 : i32
    %c63_i32_94 = arith.constant 63 : i32
    %140 = arith.minsi %139, %c63_i32_94 : i32
    %c7_i32_95 = arith.constant 7 : i32
    %141 = arith.andi %133, %c7_i32_95 : i32
    %c0_i32_96 = arith.constant 0 : i32
    %c0_i32_97 = arith.constant 0 : i32
    %142 = tpu.memref_slice %arg3[%c0_i32_96, %c0_i32_97] : memref<64x32xf32, #tpu.memory_space<any>> -> memref<1x32xf32, #tpu.memory_space<any>>
    %c0_i32_98 = arith.constant 0 : i32
    %143 = tpu.memref_slice %arg6[%133, %c0_i32_98] : memref<8x32xf32, #tpu.memory_space<vmem>> -> memref<1x32xf32, #tpu.memory_space<vmem>>
    %144 = tpu.memref_slice %arg7[%141] : memref<8x!tpu.dma_semaphore, #tpu.memory_space<semaphore_mem>> -> memref<1x!tpu.dma_semaphore, #tpu.memory_space<semaphore_mem>>
    %145 = tpu.memref_squeeze %144 : memref<1x!tpu.dma_semaphore, #tpu.memory_space<semaphore_mem>> -> memref<!tpu.dma_semaphore, #tpu.memory_space<semaphore_mem>>
    tpu.wait_dma2 semaphore(%145 : memref<!tpu.dma_semaphore, #tpu.memory_space<semaphore_mem>>) src(%142 : memref<1x32xf32, #tpu.memory_space<any>>) dst(%143 : memref<1x32xf32, #tpu.memory_space<vmem>>)
    %c8_i32_99 = arith.constant 8 : i32
    %146 = arith.cmpi slt, %134, %c8_i32_99 : i32
    %147 = arith.extui %146 : i1 to i32
    %c0_i32_100 = arith.constant 0 : i32
    %148 = arith.cmpi ne, %147, %c0_i32_100 : i32
    scf.if %148 {
      %c7_i32_150 = arith.constant 7 : i32
      %225 = arith.andi %134, %c7_i32_150 : i32
      %c0_i32_151 = arith.constant 0 : i32
      %226 = tpu.memref_slice %arg3[%140, %c0_i32_151] : memref<64x32xf32, #tpu.memory_space<any>> -> memref<1x32xf32, #tpu.memory_space<any>>
      %c0_i32_152 = arith.constant 0 : i32
      %227 = tpu.memref_slice %arg6[%134, %c0_i32_152] : memref<8x32xf32, #tpu.memory_space<vmem>> -> memref<1x32xf32, #tpu.memory_space<vmem>>
      %228 = tpu.memref_slice %arg7[%225] : memref<8x!tpu.dma_semaphore, #tpu.memory_space<semaphore_mem>> -> memref<1x!tpu.dma_semaphore, #tpu.memory_space<semaphore_mem>>
      %229 = tpu.memref_squeeze %228 : memref<1x!tpu.dma_semaphore, #tpu.memory_space<semaphore_mem>> -> memref<!tpu.dma_semaphore, #tpu.memory_space<semaphore_mem>>
      tpu.enqueue_dma source(%226 : memref<1x32xf32, #tpu.memory_space<any>>) target(%227 : memref<1x32xf32, #tpu.memory_space<vmem>>) target_semaphore(%229 : memref<!tpu.dma_semaphore, #tpu.memory_space<semaphore_mem>>)
    } else {
    }
    %c4_i32_101 = arith.constant 4 : i32
    %149 = arith.addi %84, %c4_i32_101 : i32
    %c8_i32_102 = arith.constant 8 : i32
    %150 = arith.addi %149, %c8_i32_102 : i32
    %151 = arith.addi %2, %150 : i32
    %c15_i32_103 = arith.constant 15 : i32
    %152 = arith.minsi %151, %c15_i32_103 : i32
    %153 = arith.index_cast %152 : i32 to index
    %154 = memref.load %arg2[%153] : memref<16xi32, #tpu.memory_space<smem>>
    %c0_i32_104 = arith.constant 0 : i32
    %155 = arith.maxsi %154, %c0_i32_104 : i32
    %c63_i32_105 = arith.constant 63 : i32
    %156 = arith.minsi %155, %c63_i32_105 : i32
    %c7_i32_106 = arith.constant 7 : i32
    %157 = arith.andi %149, %c7_i32_106 : i32
    %c0_i32_107 = arith.constant 0 : i32
    %c0_i32_108 = arith.constant 0 : i32
    %158 = tpu.memref_slice %arg3[%c0_i32_107, %c0_i32_108] : memref<64x32xf32, #tpu.memory_space<any>> -> memref<1x32xf32, #tpu.memory_space<any>>
    %c0_i32_109 = arith.constant 0 : i32
    %159 = tpu.memref_slice %arg6[%149, %c0_i32_109] : memref<8x32xf32, #tpu.memory_space<vmem>> -> memref<1x32xf32, #tpu.memory_space<vmem>>
    %160 = tpu.memref_slice %arg7[%157] : memref<8x!tpu.dma_semaphore, #tpu.memory_space<semaphore_mem>> -> memref<1x!tpu.dma_semaphore, #tpu.memory_space<semaphore_mem>>
    %161 = tpu.memref_squeeze %160 : memref<1x!tpu.dma_semaphore, #tpu.memory_space<semaphore_mem>> -> memref<!tpu.dma_semaphore, #tpu.memory_space<semaphore_mem>>
    tpu.wait_dma2 semaphore(%161 : memref<!tpu.dma_semaphore, #tpu.memory_space<semaphore_mem>>) src(%158 : memref<1x32xf32, #tpu.memory_space<any>>) dst(%159 : memref<1x32xf32, #tpu.memory_space<vmem>>)
    %c8_i32_110 = arith.constant 8 : i32
    %162 = arith.cmpi slt, %150, %c8_i32_110 : i32
    %163 = arith.extui %162 : i1 to i32
    %c0_i32_111 = arith.constant 0 : i32
    %164 = arith.cmpi ne, %163, %c0_i32_111 : i32
    scf.if %164 {
      %c7_i32_150 = arith.constant 7 : i32
      %225 = arith.andi %150, %c7_i32_150 : i32
      %c0_i32_151 = arith.constant 0 : i32
      %226 = tpu.memref_slice %arg3[%156, %c0_i32_151] : memref<64x32xf32, #tpu.memory_space<any>> -> memref<1x32xf32, #tpu.memory_space<any>>
      %c0_i32_152 = arith.constant 0 : i32
      %227 = tpu.memref_slice %arg6[%150, %c0_i32_152] : memref<8x32xf32, #tpu.memory_space<vmem>> -> memref<1x32xf32, #tpu.memory_space<vmem>>
      %228 = tpu.memref_slice %arg7[%225] : memref<8x!tpu.dma_semaphore, #tpu.memory_space<semaphore_mem>> -> memref<1x!tpu.dma_semaphore, #tpu.memory_space<semaphore_mem>>
      %229 = tpu.memref_squeeze %228 : memref<1x!tpu.dma_semaphore, #tpu.memory_space<semaphore_mem>> -> memref<!tpu.dma_semaphore, #tpu.memory_space<semaphore_mem>>
      tpu.enqueue_dma source(%226 : memref<1x32xf32, #tpu.memory_space<any>>) target(%227 : memref<1x32xf32, #tpu.memory_space<vmem>>) target_semaphore(%229 : memref<!tpu.dma_semaphore, #tpu.memory_space<semaphore_mem>>)
    } else {
    }
    %c5_i32_112 = arith.constant 5 : i32
    %165 = arith.addi %84, %c5_i32_112 : i32
    %c8_i32_113 = arith.constant 8 : i32
    %166 = arith.addi %165, %c8_i32_113 : i32
    %167 = arith.addi %2, %166 : i32
    %c15_i32_114 = arith.constant 15 : i32
    %168 = arith.minsi %167, %c15_i32_114 : i32
    %169 = arith.index_cast %168 : i32 to index
    %170 = memref.load %arg2[%169] : memref<16xi32, #tpu.memory_space<smem>>
    %c0_i32_115 = arith.constant 0 : i32
    %171 = arith.maxsi %170, %c0_i32_115 : i32
    %c63_i32_116 = arith.constant 63 : i32
    %172 = arith.minsi %171, %c63_i32_116 : i32
    %c7_i32_117 = arith.constant 7 : i32
    %173 = arith.andi %165, %c7_i32_117 : i32
    %c0_i32_118 = arith.constant 0 : i32
    %c0_i32_119 = arith.constant 0 : i32
    %174 = tpu.memref_slice %arg3[%c0_i32_118, %c0_i32_119] : memref<64x32xf32, #tpu.memory_space<any>> -> memref<1x32xf32, #tpu.memory_space<any>>
    %c0_i32_120 = arith.constant 0 : i32
    %175 = tpu.memref_slice %arg6[%165, %c0_i32_120] : memref<8x32xf32, #tpu.memory_space<vmem>> -> memref<1x32xf32, #tpu.memory_space<vmem>>
    %176 = tpu.memref_slice %arg7[%173] : memref<8x!tpu.dma_semaphore, #tpu.memory_space<semaphore_mem>> -> memref<1x!tpu.dma_semaphore, #tpu.memory_space<semaphore_mem>>
    %177 = tpu.memref_squeeze %176 : memref<1x!tpu.dma_semaphore, #tpu.memory_space<semaphore_mem>> -> memref<!tpu.dma_semaphore, #tpu.memory_space<semaphore_mem>>
    tpu.wait_dma2 semaphore(%177 : memref<!tpu.dma_semaphore, #tpu.memory_space<semaphore_mem>>) src(%174 : memref<1x32xf32, #tpu.memory_space<any>>) dst(%175 : memref<1x32xf32, #tpu.memory_space<vmem>>)
    %c8_i32_121 = arith.constant 8 : i32
    %178 = arith.cmpi slt, %166, %c8_i32_121 : i32
    %179 = arith.extui %178 : i1 to i32
    %c0_i32_122 = arith.constant 0 : i32
    %180 = arith.cmpi ne, %179, %c0_i32_122 : i32
    scf.if %180 {
      %c7_i32_150 = arith.constant 7 : i32
      %225 = arith.andi %166, %c7_i32_150 : i32
      %c0_i32_151 = arith.constant 0 : i32
      %226 = tpu.memref_slice %arg3[%172, %c0_i32_151] : memref<64x32xf32, #tpu.memory_space<any>> -> memref<1x32xf32, #tpu.memory_space<any>>
      %c0_i32_152 = arith.constant 0 : i32
      %227 = tpu.memref_slice %arg6[%166, %c0_i32_152] : memref<8x32xf32, #tpu.memory_space<vmem>> -> memref<1x32xf32, #tpu.memory_space<vmem>>
      %228 = tpu.memref_slice %arg7[%225] : memref<8x!tpu.dma_semaphore, #tpu.memory_space<semaphore_mem>> -> memref<1x!tpu.dma_semaphore, #tpu.memory_space<semaphore_mem>>
      %229 = tpu.memref_squeeze %228 : memref<1x!tpu.dma_semaphore, #tpu.memory_space<semaphore_mem>> -> memref<!tpu.dma_semaphore, #tpu.memory_space<semaphore_mem>>
      tpu.enqueue_dma source(%226 : memref<1x32xf32, #tpu.memory_space<any>>) target(%227 : memref<1x32xf32, #tpu.memory_space<vmem>>) target_semaphore(%229 : memref<!tpu.dma_semaphore, #tpu.memory_space<semaphore_mem>>)
    } else {
    }
    %c6_i32_123 = arith.constant 6 : i32
    %181 = arith.addi %84, %c6_i32_123 : i32
    %c8_i32_124 = arith.constant 8 : i32
    %182 = arith.addi %181, %c8_i32_124 : i32
    %183 = arith.addi %2, %182 : i32
    %c15_i32_125 = arith.constant 15 : i32
    %184 = arith.minsi %183, %c15_i32_125 : i32
    %185 = arith.index_cast %184 : i32 to index
    %186 = memref.load %arg2[%185] : memref<16xi32, #tpu.memory_space<smem>>
    %c0_i32_126 = arith.constant 0 : i32
    %187 = arith.maxsi %186, %c0_i32_126 : i32
    %c63_i32_127 = arith.constant 63 : i32
    %188 = arith.minsi %187, %c63_i32_127 : i32
    %c7_i32_128 = arith.constant 7 : i32
    %189 = arith.andi %181, %c7_i32_128 : i32
    %c0_i32_129 = arith.constant 0 : i32
    %c0_i32_130 = arith.constant 0 : i32
    %190 = tpu.memref_slice %arg3[%c0_i32_129, %c0_i32_130] : memref<64x32xf32, #tpu.memory_space<any>> -> memref<1x32xf32, #tpu.memory_space<any>>
    %c0_i32_131 = arith.constant 0 : i32
    %191 = tpu.memref_slice %arg6[%181, %c0_i32_131] : memref<8x32xf32, #tpu.memory_space<vmem>> -> memref<1x32xf32, #tpu.memory_space<vmem>>
    %192 = tpu.memref_slice %arg7[%189] : memref<8x!tpu.dma_semaphore, #tpu.memory_space<semaphore_mem>> -> memref<1x!tpu.dma_semaphore, #tpu.memory_space<semaphore_mem>>
    %193 = tpu.memref_squeeze %192 : memref<1x!tpu.dma_semaphore, #tpu.memory_space<semaphore_mem>> -> memref<!tpu.dma_semaphore, #tpu.memory_space<semaphore_mem>>
    tpu.wait_dma2 semaphore(%193 : memref<!tpu.dma_semaphore, #tpu.memory_space<semaphore_mem>>) src(%190 : memref<1x32xf32, #tpu.memory_space<any>>) dst(%191 : memref<1x32xf32, #tpu.memory_space<vmem>>)
    %c8_i32_132 = arith.constant 8 : i32
    %194 = arith.cmpi slt, %182, %c8_i32_132 : i32
    %195 = arith.extui %194 : i1 to i32
    %c0_i32_133 = arith.constant 0 : i32
    %196 = arith.cmpi ne, %195, %c0_i32_133 : i32
    scf.if %196 {
      %c7_i32_150 = arith.constant 7 : i32
      %225 = arith.andi %182, %c7_i32_150 : i32
      %c0_i32_151 = arith.constant 0 : i32
      %226 = tpu.memref_slice %arg3[%188, %c0_i32_151] : memref<64x32xf32, #tpu.memory_space<any>> -> memref<1x32xf32, #tpu.memory_space<any>>
      %c0_i32_152 = arith.constant 0 : i32
      %227 = tpu.memref_slice %arg6[%182, %c0_i32_152] : memref<8x32xf32, #tpu.memory_space<vmem>> -> memref<1x32xf32, #tpu.memory_space<vmem>>
      %228 = tpu.memref_slice %arg7[%225] : memref<8x!tpu.dma_semaphore, #tpu.memory_space<semaphore_mem>> -> memref<1x!tpu.dma_semaphore, #tpu.memory_space<semaphore_mem>>
      %229 = tpu.memref_squeeze %228 : memref<1x!tpu.dma_semaphore, #tpu.memory_space<semaphore_mem>> -> memref<!tpu.dma_semaphore, #tpu.memory_space<semaphore_mem>>
      tpu.enqueue_dma source(%226 : memref<1x32xf32, #tpu.memory_space<any>>) target(%227 : memref<1x32xf32, #tpu.memory_space<vmem>>) target_semaphore(%229 : memref<!tpu.dma_semaphore, #tpu.memory_space<semaphore_mem>>)
    } else {
    }
    %c7_i32_134 = arith.constant 7 : i32
    %197 = arith.addi %84, %c7_i32_134 : i32
    %c8_i32_135 = arith.constant 8 : i32
    %198 = arith.addi %197, %c8_i32_135 : i32
    %199 = arith.addi %2, %198 : i32
    %c15_i32_136 = arith.constant 15 : i32
    %200 = arith.minsi %199, %c15_i32_136 : i32
    %201 = arith.index_cast %200 : i32 to index
    %202 = memref.load %arg2[%201] : memref<16xi32, #tpu.memory_space<smem>>
    %c0_i32_137 = arith.constant 0 : i32
    %203 = arith.maxsi %202, %c0_i32_137 : i32
    %c63_i32_138 = arith.constant 63 : i32
    %204 = arith.minsi %203, %c63_i32_138 : i32
    %c7_i32_139 = arith.constant 7 : i32
    %205 = arith.andi %197, %c7_i32_139 : i32
    %c0_i32_140 = arith.constant 0 : i32
    %c0_i32_141 = arith.constant 0 : i32
    %206 = tpu.memref_slice %arg3[%c0_i32_140, %c0_i32_141] : memref<64x32xf32, #tpu.memory_space<any>> -> memref<1x32xf32, #tpu.memory_space<any>>
    %c0_i32_142 = arith.constant 0 : i32
    %207 = tpu.memref_slice %arg6[%197, %c0_i32_142] : memref<8x32xf32, #tpu.memory_space<vmem>> -> memref<1x32xf32, #tpu.memory_space<vmem>>
    %208 = tpu.memref_slice %arg7[%205] : memref<8x!tpu.dma_semaphore, #tpu.memory_space<semaphore_mem>> -> memref<1x!tpu.dma_semaphore, #tpu.memory_space<semaphore_mem>>
    %209 = tpu.memref_squeeze %208 : memref<1x!tpu.dma_semaphore, #tpu.memory_space<semaphore_mem>> -> memref<!tpu.dma_semaphore, #tpu.memory_space<semaphore_mem>>
    tpu.wait_dma2 semaphore(%209 : memref<!tpu.dma_semaphore, #tpu.memory_space<semaphore_mem>>) src(%206 : memref<1x32xf32, #tpu.memory_space<any>>) dst(%207 : memref<1x32xf32, #tpu.memory_space<vmem>>)
    %c8_i32_143 = arith.constant 8 : i32
    %210 = arith.cmpi slt, %198, %c8_i32_143 : i32
    %211 = arith.extui %210 : i1 to i32
    %c0_i32_144 = arith.constant 0 : i32
    %212 = arith.cmpi ne, %211, %c0_i32_144 : i32
    scf.if %212 {
      %c7_i32_150 = arith.constant 7 : i32
      %225 = arith.andi %198, %c7_i32_150 : i32
      %c0_i32_151 = arith.constant 0 : i32
      %226 = tpu.memref_slice %arg3[%204, %c0_i32_151] : memref<64x32xf32, #tpu.memory_space<any>> -> memref<1x32xf32, #tpu.memory_space<any>>
      %c0_i32_152 = arith.constant 0 : i32
      %227 = tpu.memref_slice %arg6[%198, %c0_i32_152] : memref<8x32xf32, #tpu.memory_space<vmem>> -> memref<1x32xf32, #tpu.memory_space<vmem>>
      %228 = tpu.memref_slice %arg7[%225] : memref<8x!tpu.dma_semaphore, #tpu.memory_space<semaphore_mem>> -> memref<1x!tpu.dma_semaphore, #tpu.memory_space<semaphore_mem>>
      %229 = tpu.memref_squeeze %228 : memref<1x!tpu.dma_semaphore, #tpu.memory_space<semaphore_mem>> -> memref<!tpu.dma_semaphore, #tpu.memory_space<semaphore_mem>>
      tpu.enqueue_dma source(%226 : memref<1x32xf32, #tpu.memory_space<any>>) target(%227 : memref<1x32xf32, #tpu.memory_space<vmem>>) target_semaphore(%229 : memref<!tpu.dma_semaphore, #tpu.memory_space<semaphore_mem>>)
    } else {
    }
    %213 = arith.index_cast %84 : i32 to index
    %c0 = arith.constant 0 : index
    %214 = vector.load %arg6[%213, %c0] : memref<8x32xf32, #tpu.memory_space<vmem>>, vector<8x32xf32>
    %cst = arith.constant 5.65685415 : f32
    %215 = vector.broadcast %cst : f32 to vector<8x32xf32>
    %216 = arith.mulf %214, %215 : vector<8x32xf32>
    %c0_145 = arith.constant 0 : index
    %217 = arith.index_cast %84 : i32 to index
    %c0_146 = arith.constant 0 : index
    %218 = vector.load %arg4[%c0_145, %217, %c0_146] : memref<1x8x32xf32, #tpu.memory_space<vmem>>, vector<1x8x32xf32>
    %219 = vector.shape_cast %218 : vector<1x8x32xf32> to vector<8x32xf32>
    %220 = arith.addf %216, %219 : vector<8x32xf32>
    %c0_147 = arith.constant 0 : index
    %221 = arith.index_cast %84 : i32 to index
    %c0_148 = arith.constant 0 : index
    %222 = vector.load %arg5[%c0_147, %221, %c0_148] : memref<1x8x32xf32, #tpu.memory_space<vmem>>, vector<1x8x32xf32>
    %223 = vector.shape_cast %222 : vector<1x8x32xf32> to vector<8x32xf32>
    %224 = vector.shape_cast %220 : vector<8x32xf32> to vector<1x8x32xf32>
    tpu.vector_store %arg5[%c0_147, %221, %c0_148], %224 {strides = array<i32>} : memref<1x8x32xf32, #tpu.memory_space<vmem>>, vector<1x8x32xf32>,
    %c1_i32_149 = arith.constant 1 : i32
    return
  }
  func.func @transform_1(%arg0: i32, %arg1: i32, %arg2: memref<16xi32, #tpu.memory_space<smem>>) -> (i32, i32, i32) {
    %c0_i32 = arith.constant 0 : i32
    %c0_i32_0 = arith.constant 0 : i32
    %c0_i32_1 = arith.constant 0 : i32
    return %c0_i32, %arg0, %c0_i32_0 : i32, i32, i32
  }
  func.func @transform_2(%arg0: i32, %arg1: i32, %arg2: memref<16xi32, #tpu.memory_space<smem>>) -> (i32, i32, i32) {
    %c0_i32 = arith.constant 0 : i32
    %c0_i32_0 = arith.constant 0 : i32
    return %arg1, %arg0, %c0_i32 : i32, i32, i32
  }
}

</mosaic_0001>

<bundles_post_ra>
// kernel: tpu_custom_call.1
= control target key start
LH: loop header
LB: loop body
LE: loop exit
PB: predicated region body
PF: predicated region fallthrough
CT: control target
= control target key end

     0   :  { %s1943_s0 = inlined_call_operand.vmem [shape: s32[16], index: 0, kind: input, shape index: {}]   ;;  %s1944_s1 = inlined_call_operand.vmem [shape: f32[64,32], index: 1, kind: input, shape index: {}]   ;;  %s1945_s2 = inlined_call_operand.vmem [shape: f32[1,16,32], index: 2, kind: input, shape index: {}]   ;;  %s1946_s3 = inlined_call_operand.hbm [shape: f32[2,8,32], index: 3, kind: output, shape index: {}]  }
   0x1   :  { %s8_s14 = sshll.u32 %s1943_s0, 4  ;;  %s9_s14 = int_to_ptr.vmem [resolvable:$true] %s8_s14 }
   0x2   :  { %s1651_s15 = scalar_lea.vmem %s9_s14, 16  ;;  %p1656_p1 = scmp.lt.s32.totalorder %s9_s14, %s9_s14 }
   0x3   :  { %p1652_p0 = scmp.ne.s32.totalorder %s9_s14, %s1651_s15  ;;  %p1657_p2 = scmp.lt.s32.totalorder %s1651_s15, %s1651_s15 }
   0x5   :  { %p1658_p3 = por %p1657_p2, %p1656_p1 }
   0x7   :  { %p1659_p4 = pnand %p1658_p3, %p1652_p0 }
   0x9   :  { %1662 = shalt.err (!%p1659_p4)  }
   0xa   :  { %s1761_s16 = smov [#allocation5]  }
   0xb   :  { %11 = dma.vmem_to_smem %s9_s14, 16, %s1761_s16, [#allocation4] }
   0xc   :  { %1715 = dma.done.wait [#allocation4], 16 }
   0xd   :  { %1716 = vsyncadd [#allocation4], 4294967280 }
   0xe   :  { %13 = sfence }
   0xf   :  { %14 = vsyncpa [#allocation7], 0 }
  0x10   :  { %16 = vsyncpa [#allocation7 + $0x1], 0  ;;  %s1786_s17 = smov 0   ;;  %s1788_s18 = smov 0  }
  0x11   :  { %s1790_s0 = smov 0   ;;  %s1792_s19 = smov 0  }
  0x12   :  { %s1794_s20 = smov 0   ;;  %s1796_s21 = smov 0  }
  0x13 LB: > { %s1464_s22 = sadd.s32 4294967295, %s1759_s21   ;;  %s1465_s23 = sadd.s32 4294967294, %s1759_s21   ;;  %s1759_s21 = sphi %s1796_s21, %s22_s21   ;;  %s1755_s20 = sphi %s1794_s20, %s1953_s20   ;;  %s1751_s19 = sphi %s1792_s19, %s1952_s19   ;;  %s1747_s0 = sphi %s1790_s0, %s1951_s0   ;;  %s1743_s18 = sphi %s1788_s18, %s1950_s18   ;;  %s1739_s17 = sphi %s1786_s17, %s1949_s17  }
  0x14   : > { %s31_s24 = sadd.s32 1, %s1755_s20  ;;  %s69_s25 = sadd.s32 1, %s1747_s0 }
  0x15   : > { %p32_p5 = scmp.ge.s32.totalorder %s31_s24, 2  ;;  %p79_p6 = scmp.ne.s32.totalorder %s1747_s0, %s1743_s18 }
  0x16   : > { %p80_p7 = scmp.eq.s32.totalorder %s1464_s22, 1  ;;  %p85_p8 = scmp.ne.s32.totalorder %s1743_s18, %s1739_s17 }
  0x17   : > { %s1955_s24 = smov (%p32_p5, %s31_s24), 0  ;;  %p86_p10 = scmp.eq.s32.totalorder %s1465_s23, 1 }
  0x18   : > { %p1826_p9 = por %p80_p7, %p79_p6  ;;  %s64_s27 = ssub.s32 %s1755_s20, %s1955_s24 }
  0x19   : > { %p1468_p11 = scmp.ge.s32.totalorder %s1759_s21, 1  ;;  %p67_p12 = scmp.eq.s32.totalorder %s64_s27, 0 }
  0x1a   : > { %p1833_p13 = por %p86_p10, %p85_p8  ;;  %p111_p0 = scmp.lt.s32.totalorder %s1759_s21, 3 }
  0x1b   : > { %s1839_s29 = scalar_select %p67_p12, %s1747_s0, %s69_s25  }
  0x1c   : > { %p112_p1 = pnand %p1468_p11, %p111_p0 }
  0x1d   : > { %s127_s30 = sand.u32 (!%p112_p1), 1, %s1743_s18   ;;  %s1843_s4 = sshll.u32 (!%p112_p1), %s1751_s19, 3 }
  0x1e   : > { %115 = sbr.rel (%p112_p1) target bundleno = 211 (0xd3), region = 24  ;;  %s1847_s5 = sshll.u32 (!%p112_p1), %s127_s30, 3 }
  0x1f   : > { %p137_p2 = scmp.lt.s32.totalorder (!%p112_p1), %s1843_s4, 15  ;;  %s129_s11 = scalar_lea.vmem (!%p112_p1), [#allocation6], %s1847_s5 }
  0x25   : > { %s138_s6 = scalar_select %p137_p2, %s1843_s4, 15 }
  0x27   : > { %s139_s7 = sld [smem:[#allocation5 + %s138_s6]] }
  0x2d   : > { %p140_p3 = scmp.gt.s32.totalorder %s139_s7, 0  ;;  %p1471_p4 = scmp.lt.s32.totalorder %s139_s7, 63 }
  0x2f   : > { %s1957_s7 = smov (!%p140_p3, %s139_s7), 0 }
  0x30   : > { %s1959_s7 = smov (!%p1471_p4, %s1957_s7), 63 }
  0x31   : > { %s144_s10 = scalar_lea.vmem %s1944_s1, %s1959_s7 }
  0x32   : > { %v162_v0 = vld [vmem:[%s144_s10] sm:$0x1] }
  0x33   : > { %163 = vst [vmem:[#allocation2] sm:$0x1] %v162_v0 }
  0x34   : > { %188 = vsyncadd [#allocation3], 16  ;;  %s189_s12 = sadd.s32 1, %s1843_s4 }
  0x35   : > { %p190_p5 = scmp.lt.s32.totalorder %s189_s12, 15 }
  0x37   : > { %s1961_s12 = smov (!%p190_p5, %s189_s12), 15 }
  0x38   : > { %s192_s13 = sld [smem:[#allocation5 + %s1961_s12]] }
  0x3e   : > { %p193_p6 = scmp.gt.s32.totalorder %s192_s13, 0  ;;  %p1476_p7 = scmp.lt.s32.totalorder %s192_s13, 63 }
  0x40   : > { %s1963_s13 = smov (!%p193_p6, %s192_s13), 0 }
  0x41   : > { %s1965_s13 = smov (!%p1476_p7, %s1963_s13), 63 }
  0x42   : > { %s197_s16 = scalar_lea.vmem %s1944_s1, %s1965_s13 }
  0x43   : > { %v217_v1 = vld [vmem:[%s197_s16] sm:$0x1] }
  0x44   : > { %218 = vst [vmem:[#allocation2 + $0x1] sm:$0x1] %v217_v1 }
  0x45   : > { %243 = vsyncadd [#allocation3 + $0x1], 16  ;;  %s244_s22 = sadd.s32 2, %s1843_s4 }
  0x46   : > { %p245_p8 = scmp.lt.s32.totalorder %s244_s22, 15 }
  0x48   : > { %s1967_s22 = smov (!%p245_p8, %s244_s22), 15 }
  0x49   : > { %s247_s23 = sld [smem:[#allocation5 + %s1967_s22]] }
  0x4f   : > { %p248_p10 = scmp.gt.s32.totalorder %s247_s23, 0  ;;  %p1481_p11 = scmp.lt.s32.totalorder %s247_s23, 63 }
  0x51   : > { %s1969_s23 = smov (!%p248_p10, %s247_s23), 0 }
  0x52   : > { %s1971_s23 = smov (!%p1481_p11, %s1969_s23), 63 }
  0x53   : > { %s252_s6 = scalar_lea.vmem %s1944_s1, %s1971_s23 }
  0x54   : > { %v272_v2 = vld [vmem:[%s252_s6] sm:$0x1] }
  0x55   : > { %273 = vst [vmem:[#allocation2 + $0x2] sm:$0x1] %v272_v2 }
  0x56   : > { %298 = vsyncadd [#allocation3 + $0x2], 16  ;;  %s299_s7 = sadd.s32 3, %s1843_s4 }
  0x57   : > { %p300_p12 = scmp.lt.s32.totalorder %s299_s7, 15 }
  0x59   : > { %s1973_s7 = smov (!%p300_p12, %s299_s7), 15 }
  0x5a   : > { %s302_s8 = sld [smem:[#allocation5 + %s1973_s7]] }
  0x60   : > { %p303_p0 = scmp.gt.s32.totalorder %s302_s8, 0  ;;  %p1486_p1 = scmp.lt.s32.totalorder %s302_s8, 63 }
  0x62   : > { %s1975_s8 = smov (!%p303_p0, %s302_s8), 0 }
  0x63   : > { %s1977_s8 = smov (!%p1486_p1, %s1975_s8), 63 }
  0x64   : > { %s307_s12 = scalar_lea.vmem %s1944_s1, %s1977_s8 }
  0x65   : > { %v327_v3 = vld [vmem:[%s307_s12] sm:$0x1] }
  0x66   : > { %328 = vst [vmem:[#allocation2 + $0x3] sm:$0x1] %v327_v3 }
  0x67   : > { %353 = vsyncadd [#allocation3 + $0x3], 16  ;;  %s354_s13 = sadd.s32 4, %s1843_s4 }
  0x68   : > { %p355_p2 = scmp.lt.s32.totalorder %s354_s13, 15 }
  0x6a   : > { %s1979_s13 = smov (!%p355_p2, %s354_s13), 15 }
  0x6b   : > { %s357_s14 = sld [smem:[#allocation5 + %s1979_s13]] }
  0x71   : > { %p358_p3 = scmp.gt.s32.totalorder %s357_s14, 0  ;;  %p1491_p4 = scmp.lt.s32.totalorder %s357_s14, 63 }
  0x73   : > { %s1981_s14 = smov (!%p358_p3, %s357_s14), 0 }
  0x74   : > { %s1983_s14 = smov (!%p1491_p4, %s1981_s14), 63 }
  0x75   : > { %s362_s22 = scalar_lea.vmem %s1944_s1, %s1983_s14 }
  0x76   : > { %v382_v4 = vld [vmem:[%s362_s22] sm:$0x1] }
  0x77   : > { %383 = vst [vmem:[#allocation2 + $0x4] sm:$0x1] %v382_v4 }
  0x78   : > { %408 = vsyncadd [#allocation3 + $0x4], 16  ;;  %s409_s23 = sadd.s32 5, %s1843_s4 }
  0x79   : > { %p410_p5 = scmp.lt.s32.totalorder %s409_s23, 15 }
  0x7b   : > { %s1985_s23 = smov (!%p410_p5, %s409_s23), 15 }
  0x7c   : > { %s412_s25 = sld [smem:[#allocation5 + %s1985_s23]] }
  0x82   : > { %p413_p6 = scmp.gt.s32.totalorder %s412_s25, 0  ;;  %p1496_p7 = scmp.lt.s32.totalorder %s412_s25, 63 }
  0x84   : > { %s1987_s25 = smov (!%p413_p6, %s412_s25), 0 }
  0x85   : > { %s1989_s25 = smov (!%p1496_p7, %s1987_s25), 63 }
  0x86   : > { %s417_s7 = scalar_lea.vmem %s1944_s1, %s1989_s25 }
  0x87   : > { %v437_v5 = vld [vmem:[%s417_s7] sm:$0x1] }
  0x88   : > { %438 = vst [vmem:[#allocation2 + $0x5] sm:$0x1] %v437_v5 }
  0x89   : > { %463 = vsyncadd [#allocation3 + $0x5], 16  ;;  %s464_s8 = sadd.s32 6, %s1843_s4 }
  0x8a   : > { %p465_p8 = scmp.lt.s32.totalorder %s464_s8, 15 }
  0x8c   : > { %s1991_s8 = smov (!%p465_p8, %s464_s8), 15 }
  0x8d   : > { %s467_s9 = sld [smem:[#allocation5 + %s1991_s8]] }
  0x93   : > { %p468_p10 = scmp.gt.s32.totalorder %s467_s9, 0  ;;  %p1501_p11 = scmp.lt.s32.totalorder %s467_s9, 63 }
  0x95   : > { %s1993_s9 = smov (!%p468_p10, %s467_s9), 0 }
  0x96   : > { %s1995_s9 = smov (!%p1501_p11, %s1993_s9), 63 }
  0x97   : > { %s472_s13 = scalar_lea.vmem %s1944_s1, %s1995_s9 }
  0x98   : > { %v492_v6 = vld [vmem:[%s472_s13] sm:$0x1] }
  0x99   : > { %493 = vst [vmem:[#allocation2 + $0x6] sm:$0x1] %v492_v6 }
  0x9a   : > { %518 = vsyncadd [#allocation3 + $0x6], 16  ;;  %s519_s14 = sadd.s32 7, %s1843_s4 }
  0x9b   : > { %p520_p12 = scmp.lt.s32.totalorder %s519_s14, 15 }
  0x9d   : > { %s1997_s14 = smov (!%p520_p12, %s519_s14), 15 }
  0x9e   : > { %s522_s15 = sld [smem:[#allocation5 + %s1997_s14]] }
  0xa4   : > { %p523_p0 = scmp.gt.s32.totalorder %s522_s15, 0  ;;  %p1506_p1 = scmp.lt.s32.totalorder %s522_s15, 63 }
  0xa6   : > { %s1999_s15 = smov (!%p523_p0, %s522_s15), 0 }
  0xa7   : > { %s2001_s15 = smov (!%p1506_p1, %s1999_s15), 63 }
  0xa8   : > { %s527_s23 = scalar_lea.vmem %s1944_s1, %s2001_s15 }
  0xa9   : > { %v547_v7 = vld [vmem:[%s527_s23] sm:$0x1] }
  0xaa   : > { %548 = vst [vmem:[#allocation2 + $0x7] sm:$0x1] %v547_v7 }
  0xab   : > { %573 = vsyncadd [#allocation3 + $0x7], 16 }
  0xac   : > { %1717 = dma.done.wait [#allocation3], 16 }
  0xad   : > { %1718 = vsyncadd [#allocation3], 4294967280 }
  0xae   : > { %1719 = dma.done.wait [#allocation3 + $0x1], 16 }
  0xaf   : > { %1720 = vsyncadd [#allocation3 + $0x1], 4294967280 }
  0xb0   : > { %1721 = dma.done.wait [#allocation3 + $0x2], 16 }
  0xb1   : > { %1722 = vsyncadd [#allocation3 + $0x2], 4294967280 }
  0xb2   : > { %1723 = dma.done.wait [#allocation3 + $0x3], 16 }
  0xb3   : > { %1724 = vsyncadd [#allocation3 + $0x3], 4294967280 }
  0xb4   : > { %1725 = dma.done.wait [#allocation3 + $0x4], 16 }
  0xb5   : > { %1726 = vsyncadd [#allocation3 + $0x4], 4294967280 }
  0xb6   : > { %1727 = dma.done.wait [#allocation3 + $0x5], 16 }
  0xb7   : > { %1728 = vsyncadd [#allocation3 + $0x5], 4294967280 }
  0xb8   : > { %1729 = dma.done.wait [#allocation3 + $0x6], 16 }
  0xb9   : > { %1730 = vsyncadd [#allocation3 + $0x6], 4294967280 }
  0xba   : > { %1731 = dma.done.wait [#allocation3 + $0x7], 16 }
  0xbb   : > { %1732 = vsyncadd [#allocation3 + $0x7], 4294967280  ;;  %v1102_v8 = vld [vmem:[#allocation2] sm:$0xff]  ;;  %s1552_s27 = sshll.u32 %s1751_s19, 7  ;;  %s1123_s6 = sshll.u32 %s129_s11, 4  ;;  %vm1106_vm0 = vcmask 261120   ;;  %s1894_s6 = int_to_ptr.vmem [resolvable:$true] %s1123_s6 }
  0xbc   : > { %v1104_v9 = vld [vmem:[%s1945_s2] sm:$0xff]  ;;  %v1103_v10 = vmul.f32 5.656854, %v1102_v8  ;;  %s1892_s9 = scalar_lea.hbm %s1946_s3, %s1552_s27  ;;  %s1109_s10 = scalar_lea.sflag [#allocation7], %s127_s30 }
  0xbd   : > { %s1663_s19 = scalar_lea.vmem %s1894_s6, 128  ;;  %s1762_s12 = smov [#allocation6]  }
  0xbe   : > { %v1105_v11 = vadd.f32 %v1104_v9, %v1103_v10  ;;  %p1664_p2 = scmp.ne.s32.totalorder %s1894_s6, %s1663_s19  ;;  %s1667_s13 = sshll.u32 %s1762_s12, 4  ;;  %s1668_s13 = int_to_ptr.vmem [resolvable:$false] %s1667_s13 }
  0xbf   : > { %s1669_s14 = scalar_lea.vmem %s1668_s13, 256  ;;  %p1670_p5 = scmp.lt.s32.totalorder %s1894_s6, %s1668_s13 }
  0xc0   : > { %1107 = vst.msk [vmem:[%s129_s11] sm:$0xff] %vm1106_vm0, %v1105_v11  ;;  %p1665_p3 = pnand %p1664_p2, %p1826_p9  ;;  %p1671_p6 = scmp.lt.s32.totalorder %s1669_s14, %s1663_s19 }
  0xc2   : > { %p1666_p4 = pneg %p1665_p3  ;;  %p1672_p7 = por %p1671_p6, %p1670_p5 }
  0xc4   : > { %p1673_p8 = pnand %p1672_p7, %p1666_p4 }
  0xc6   : > { %1676 = shalt.err (!%p1673_p8)
}
  0xc7   : > { %s1677_s30 = scalar_lea.hbm %s1892_s9, 128  ;;  %s1681_s15 = scalar_lea.hbm %s1946_s3, 256 }
  0xc8   : > { %p1678_p10 = scmp.ne.s32.totalorder %s1892_s9, %s1677_s30  ;;  %p1682_p0 = scmp.lt.u32.totalorder %s1892_s9, %s1946_s3 }
  0xc9   : > { %p1683_p1 = scmp.lt.u32.totalorder %s1681_s15, %s1677_s30  ;;  %p1685_p3 = scmp.lt.u32.totalorder %s1677_s30, %s1892_s9 }
  0xca   : > { %p1679_p11 = pnand %p1678_p10, %p1826_p9 }
  0xcb   : > { %p1684_p2 = por %p1683_p1, %p1682_p0 }
  0xcc   : > { %p1680_p12 = pneg %p1679_p11 }
  0xcd   : > { %p1686_p4 = por %p1685_p3, %p1684_p2 }
  0xcf   : > { %p1687_p5 = pnand %p1686_p4, %p1680_p12 }
  0xd1   : > { %1690 = shalt.err (!%p1687_p5)
}
  0xd2   : > { %1595 = dma.vmem_to_hbm [thread:$0]  (%p1826_p9), %s1894_s6, 128, %s1892_s9, %s1109_s10  }
  0xd3 PF: > { %p1601_p6 = scmp.ge.s32.totalorder %s1759_s21, 2  ;;  %s1135_s23 = sand.u32 1, %s1739_s17  }
  0xd4   : > { %s1136_s4 = scalar_lea.sflag [#allocation7], %s1135_s23 }
  0xd5   : > { %p1598_p7 = pnand %p1601_p6, %p1833_p13 }
  0xd7   : > { %1734 = dma.done.wait (!%p1598_p7), %s1136_s4, 128  }
  0xd8   : > { %1736 = vsyncadd (!%p1598_p7), %s1136_s4, 4294967168  ;;  %s22_s21 = sadd.s32 1, %s1759_s21   ;;  %s1949_s17 = smov %s1743_s18 }
  0xd9   : > { %p19_p8 = scmp.ge.s32.totalorder %s22_s21, 4   ;;  %s1950_s18 = smov %s1747_s0 }
  0xda   : > { %s1951_s0 = smov %s1839_s29  ;;  %s1952_s19 = smov %s1755_s20 }
  0xdb   : > { %s1953_s20 = smov %s1955_s24  ;;  %21 = sbr.rel (!%p19_p8) target bundleno = 19 (0x13), region = 792 }
  0xe2   :  { %1141 = vsyncpa [#allocation7], 1 }
  0xe3   :  { %1143 = vsyncpa [#allocation7 + $0x1], 1 }
  0xe4   :  { %1144 = vsyncmov [#allocation3] }
  0xe7   :  { %s1145_s26 = vpop.sfrf %1144 }
  0xe8   :  { %p1555_p9 = scmp.ne.s32.totalorder %s1145_s26, 0 }
  0xea   :  { %1149 = shalt.err (%p1555_p9)  }
  0xeb   :  { %1151 = vsyncmov [#allocation3 + $0x1] }
  0xee   :  { %s1152_s28 = vpop.sfrf %1151 }
  0xef   :  { %p1556_p13 = scmp.ne.s32.totalorder %s1152_s28, 0 }
  0xf1   :  { %1156 = shalt.err (%p1556_p13)  }
  0xf2   :  { %1158 = vsyncmov [#allocation3 + $0x2] }
  0xf5   :  { %s1159_s25 = vpop.sfrf %1158 }
  0xf6   :  { %p1557_p10 = scmp.ne.s32.totalorder %s1159_s25, 0 }
  0xf8   :  { %1163 = shalt.err (%p1557_p10)  }
  0xf9   :  { %1165 = vsyncmov [#allocation3 + $0x3] }
  0xfc   :  { %s1166_s29 = vpop.sfrf %1165 }
  0xfd   :  { %p1558_p11 = scmp.ne.s32.totalorder %s1166_s29, 0 }
  0xff   :  { %1170 = shalt.err (%p1558_p11)  }
 0x100   :  { %1172 = vsyncmov [#allocation3 + $0x4] }
 0x103   :  { %s1173_s21 = vpop.sfrf %1172 }
 0x104   :  { %p1559_p12 = scmp.ne.s32.totalorder %s1173_s21, 0 }
 0x106   :  { %1177 = shalt.err (%p1559_p12)  }
 0x107   :  { %1179 = vsyncmov [#allocation3 + $0x5] }
 0x10a   :  { %s1180_s1 = vpop.sfrf %1179 }
 0x10b   :  { %p1560_p0 = scmp.ne.s32.totalorder %s1180_s1, 0 }
 0x10d   :  { %1184 = shalt.err (%p1560_p0)  }
 0x10e   :  { %1186 = vsyncmov [#allocation3 + $0x6] }
 0x111   :  { %s1187_s2 = vpop.sfrf %1186 }
 0x112   :  { %p1561_p1 = scmp.ne.s32.totalorder %s1187_s2, 0 }
 0x114   :  { %1191 = shalt.err (%p1561_p1)  }
 0x115   :  { %1193 = vsyncmov [#allocation3 + $0x7] }
 0x118   :  { %s1194_s3 = vpop.sfrf %1193 }
 0x119   :  { %p1562_p2 = scmp.ne.s32.totalorder %s1194_s3, 0 }
 0x11b   :  { %1198 = shalt.err (%p1562_p2)  }

</bundles_post_ra>
